<compile_context>
chip_gen: v7x
topology: tpu7x:2x2x1
jax: 0.10.0
libtpu: 0.0.40
codegen_flags: <defaults>
</compile_context>

<pallas_src>
import functools

import jax
import jax.numpy as jnp
from jax.experimental import pallas as pl
from jax.experimental.pallas import tpu as pltpu


def _round_up(a, b):
    return (a + b - 1) // b * b


# --------------------------------------------------------------------------
# Pass 1: conv matmul (+ optional per-tile BN partial statistics)
# --------------------------------------------------------------------------
def _conv_matmul_kernel(a_ref, w_ref, o_ref, *stats_refs, single_k_step):
    # a_ref: (TILE_M, TILE_K) bf16 patches tile
    # w_ref: (TILE_K, TILE_N) bf16 reshaped conv weight tile
    # o_ref: (TILE_M, TILE_N) f32 conv output (resident across the K axis)
    # stats_refs[0] (bn_act only): (1, 8, TILE_N) f32 -> row0 = sum, row1 = sumsq
    def _emit_stats(acc):
        s1 = jnp.sum(acc, axis=0, keepdims=True)           # (1, TILE_N)
        s2 = jnp.sum(acc * acc, axis=0, keepdims=True)      # (1, TILE_N)
        pad = jnp.zeros((6, s1.shape[1]), jnp.float32)
        stats_refs[0][...] = jnp.concatenate([s1, s2, pad], axis=0)[None]

    if single_k_step:                       # static (trace-time) specialization
        acc = jnp.dot(a_ref[...], w_ref[...],
                      preferred_element_type=jnp.float32)
        o_ref[...] = acc
        if stats_refs:
            _emit_stats(acc)
    else:
        k_idx = pl.program_id(2)

        @pl.when(k_idx == 0)
        def _():
            o_ref[...] = jnp.zeros_like(o_ref)

        o_ref[...] += jnp.dot(a_ref[...], w_ref[...],
                              preferred_element_type=jnp.float32)

        if stats_refs:                      # static branch: bn_act mode only
            @pl.when(k_idx == pl.num_programs(2) - 1)
            def _():
                _emit_stats(o_ref[...])


# --------------------------------------------------------------------------
# Pass 2: folded BN affine + ReLU (memory-bound elementwise)
# --------------------------------------------------------------------------
def _bn_relu_kernel(y_ref, s_ref, b_ref, o_ref):
    o_ref[...] = jnp.maximum(y_ref[...] * s_ref[...] + b_ref[...],
                             0.0).astype(o_ref.dtype)


# --------------------------------------------------------------------------
# im2col in NHWC layout (channels on the lane axis; no 6-D relayout)
# --------------------------------------------------------------------------
def _im2col_nhwc(x_nhwc, kh, kw, stride, padding, dilation):
    n, h, w, c = x_nhwc.shape
    sh, sw = stride
    ph, pw = padding
    dh, dw = dilation
    oh = (h + 2 * ph - dh * (kh - 1) - 1) // sh + 1
    ow = (w + 2 * pw - dw * (kw - 1) - 1) // sw + 1
    xp = jnp.pad(x_nhwc, ((0, 0), (ph, ph), (pw, pw), (0, 0)))
    taps = []
    for i in range(kh):
        for j in range(kw):
            taps.append(xp[:, i * dh: i * dh + sh * (oh - 1) + 1: sh,
                            j * dw: j * dw + sw * (ow - 1) + 1: sw, :])
    # K ordering = (kh, kw, cin); matches weight.transpose(2, 3, 1, 0) below.
    col = jnp.concatenate(taps, axis=-1)            # (N, OH, OW, KH*KW*C)
    return col.reshape(n * oh * ow, kh * kw * c), oh, ow


# --------------------------------------------------------------------------
# Wrapper
# --------------------------------------------------------------------------
def conv_block_forward(x, weight, bn_gamma, bn_beta, *, stride, padding,
                       dilation=(1, 1), bn_act=False, eps=1e-5,
                       compute_dtype=jnp.bfloat16):
    """Pallas implementation of conv_block.forward.

    x:      (N, Cin, H, W)   float32, NCHW
    weight: (Cout, Cin, KH, KW)
    Returns (N, Cout, OH, OW) float32.
    """
    n, cin, _, _ = x.shape
    cout, _, kh, kw = weight.shape

    x_nhwc = jnp.transpose(x, (0, 2, 3, 1))
    patches, oh, ow = _im2col_nhwc(x_nhwc, kh, kw, stride, padding, dilation)
    m, k = patches.shape
    w2d = jnp.transpose(weight, (2, 3, 1, 0)).reshape(k, cout)  # (K, Cout)

    # ---- tiling / padding decisions ---------------------------------------
    cout_p = _round_up(cout, 128)              # lane-dense output columns
    if cout_p <= 512:
        tile_n = cout_p
    else:
        tile_n = max(t for t in (512, 384, 256, 128) if cout_p % t == 0)
    num_n = cout_p // tile_n

    tile_m = min(512, _round_up(m, 8))         # big M tiles; 1 step for tiny M
    m_pad = _round_up(m, tile_m)
    num_m = m_pad // tile_m

    if k <= 2048:                              # keep K resident (no K loop)
        tile_k, k_pad = k, k
    else:                                      # large K: reduce over a K axis
        tile_k = 512
        k_pad = _round_up(k, tile_k)
    num_k = k_pad // tile_k

    itemsize = jnp.dtype(compute_dtype).itemsize
    patches = jnp.pad(patches,
                      ((0, m_pad - m), (0, k_pad - k))).astype(compute_dtype)
    w2d = jnp.pad(w2d, ((0, k_pad - k), (0, cout_p - cout))).astype(compute_dtype)

    # VMEM budget: double-buffered bf16 inputs + resident f32 output tile.
    est = ((2 * tile_m * tile_k + 2 * tile_k * tile_n) * itemsize
           + 2 * tile_m * tile_n * 4 + 2 * 8 * tile_n * 4)
    vmem_limit = int(min(64 * 2**20, max(32 * 2**20, 2 * est)))

    out_shapes = [jax.ShapeDtypeStruct((m_pad, cout_p), jnp.float32)]
    out_specs = [pl.BlockSpec((tile_m, tile_n), lambda i, j, kk: (i, j))]
    if bn_act:
        out_shapes.append(jax.ShapeDtypeStruct((num_m, 8, cout_p), jnp.float32))
        out_specs.append(pl.BlockSpec((1, 8, tile_n), lambda i, j, kk: (i, 0, j)))

    cost = pl.CostEstimate(
        flops=2 * m_pad * k_pad * cout_p,
        transcendentals=0,
        bytes_accessed=int(patches.size * itemsize + w2d.size * itemsize
                           + m_pad * cout_p * 4))

    kernel = functools.partial(_conv_matmul_kernel,
                               single_k_step=(num_k == 1))

    conv_outs = pl.pallas_call(
        kernel,
        out_shape=tuple(out_shapes),
        grid_spec=pltpu.PrefetchScalarGridSpec(
            num_scalar_prefetch=0,
            grid=(num_m, num_n, num_k),
            in_specs=[
                pl.BlockSpec((tile_m, tile_k), lambda i, j, kk: (i, kk)),
                pl.BlockSpec((tile_k, tile_n), lambda i, j, kk: (kk, j)),
            ],
            out_specs=tuple(out_specs),
        ),
        compiler_params=pltpu.CompilerParams(
            dimension_semantics=("parallel", "parallel", "arbitrary"),
            vmem_limit_bytes=vmem_limit),
        cost_estimate=cost,
    )(patches, w2d)

    if bn_act:
        conv2d, stats = conv_outs
        # Reduce per-tile partials (padded M rows / Cout cols are zero).
        sums = jnp.sum(stats[:, 0, :], axis=0)
        sumsq = jnp.sum(stats[:, 1, :], axis=0)
        mean = sums / m
        var = jnp.maximum(sumsq / m - mean * mean, 0.0)  # biased var (PyTorch fwd)
        gamma_p = jnp.pad(bn_gamma.astype(jnp.float32), (0, cout_p - cout),
                          constant_values=1.0)
        beta_p = jnp.pad(bn_beta.astype(jnp.float32), (0, cout_p - cout))
        scale = (gamma_p / jnp.sqrt(var + eps)).reshape(1, cout_p)
        bias = (beta_p - mean * scale[0]).reshape(1, cout_p)

        out2d = pl.pallas_call(
            _bn_relu_kernel,
            out_shape=jax.ShapeDtypeStruct((m_pad, cout_p), jnp.float32),
            grid_spec=pltpu.PrefetchScalarGridSpec(
                num_scalar_prefetch=0,
                grid=(num_m, num_n),
                in_specs=[
                    pl.BlockSpec((tile_m, tile_n), lambda i, j: (i, j)),
                    pl.BlockSpec((1, tile_n), lambda i, j: (0, j)),
                    pl.BlockSpec((1, tile_n), lambda i, j: (0, j)),
                ],
                out_specs=pl.BlockSpec((tile_m, tile_n), lambda i, j: (i, j)),
            ),
            compiler_params=pltpu.CompilerParams(
                dimension_semantics=("parallel", "parallel")),
        )(conv2d, scale, bias)
    else:
        out2d = conv_outs[0] if isinstance(conv_outs, (tuple, list)) else conv_outs

    # Drop M / Cout padding BEFORE the NCHW reshape.
    out2d = out2d[:m, :cout]
    return out2d.reshape(n, oh, ow, cout).transpose(0, 3, 1, 2)


# --------------------------------------------------------------------------
# Pure-JAX reference
# --------------------------------------------------------------------------
def _reference(x, weight, bn_gamma, bn_beta, *, stride, padding, dilation,
               bn_act, eps=1e-5):
    y = jax.lax.conv_general_dilated(
        x, weight, window_strides=stride,
        padding=[(padding[0], padding[0]), (padding[1], padding[1])],
        rhs_dilation=dilation,
        dimension_numbers=("NCHW", "OIHW", "NCHW"))
    if bn_act:
        mean = jnp.mean(y, axis=(0, 2, 3), keepdims=True)
        var = jnp.mean((y - mean) ** 2, axis=(0, 2, 3), keepdims=True)
        y = (y - mean) / jnp.sqrt(var + eps)
        y = y * bn_gamma.reshape(1, -1, 1, 1) + bn_beta.reshape(1, -1, 1, 1)
        y = jnp.maximum(y, 0.0)
    return y


def _check(out, ref, name, atol=2e-2, rtol=2e-2):
    assert out.shape == ref.shape, f"{name}: shape {out.shape} vs {ref.shape}"
    assert jnp.allclose(out, ref, atol=atol, rtol=rtol), f"{name} mismatch"


if __name__ == "__main__":
    # conv_block(in_channels=4, out_channels=8, kernel_size=3, stride=1,
    #            padding=1, dilation=(1,1), group=1, bn_act=True, bias=False)
    key = jax.random.PRNGKey(0)
    kx, kw, kg, kb, kx2, kw2, kx3, kw3, kg3, kb3 = jax.random.split(key, 10)

    N, CIN, H, W = 2, 4, 16, 16
    COUT, KH, KW = 8, 3, 3
    stride, padding, dilation = (1, 1), (1, 1), (1, 1)

    x = jax.random.normal(kx, (N, CIN, H, W), dtype=jnp.float32)
    weight = jax.random.normal(kw, (COUT, CIN, KH, KW), dtype=jnp.float32) * 0.1
    bn_gamma = 1.0 + 0.1 * jax.random.normal(kg, (COUT,), dtype=jnp.float32)
    bn_beta = 0.1 * jax.random.normal(kb, (COUT,), dtype=jnp.float32)

    # --- bn_act=True (conv + SyncBN + ReLU), single M/N/K tile ---------------
    out = conv_block_forward(x, weight, bn_gamma, bn_beta, stride=stride,
                             padding=padding, dilation=dilation, bn_act=True)
    out = jax.block_until_ready(out)
    ref = _reference(x, weight, bn_gamma, bn_beta, stride=stride,
                     padding=padding, dilation=dilation, bn_act=True)
    _check(out, ref, "bn_act")

    # --- plain conv branch (bn_act=False) ------------------------------------
    out2 = conv_block_forward(x, weight, bn_gamma, bn_beta, stride=stride,
                              padding=padding, dilation=dilation, bn_act=False)
    out2 = jax.block_until_ready(out2)
    ref2 = _reference(x, weight, bn_gamma, bn_beta, stride=stride,
                      padding=padding, dilation=dilation, bn_act=False)
    _check(out2, ref2, "conv")

    # --- multi-M-tile case (exercises M padding + cross-tile BN stats) -------
    H2 = W2 = 24                                  # m = 2*24*24 = 1152 -> 3 tiles
    x2 = jax.random.normal(kx2, (N, CIN, H2, W2), dtype=jnp.float32)
    out3 = conv_block_forward(x2, weight, bn_gamma, bn_beta, stride=stride,
                              padding=padding, dilation=dilation, bn_act=True)
    out3 = jax.block_until_ready(out3)
    ref3 = _reference(x2, weight, bn_gamma, bn_beta, stride=stride,
                      padding=padding, dilation=dilation, bn_act=True)
    _check(out3, ref3, "multi-M")

    # --- multi-Cout-tile case (1x1 conv, cout_p=640 -> 5 lane tiles) ---------
    CIN4, COUT4 = 16, 640
    x4 = jax.random.normal(kx3, (2, CIN4, 8, 8), dtype=jnp.float32)
    w4 = jax.random.normal(kw2, (COUT4, CIN4, 1, 1), dtype=jnp.float32) * 0.1
    g4 = 1.0 + 0.1 * jax.random.normal(kg3, (COUT4,), dtype=jnp.float32)
    b4 = 0.1 * jax.random.normal(kb3, (COUT4,), dtype=jnp.float32)
    out4 = conv_block_forward(x4, w4, g4, b4, stride=(1, 1), padding=(0, 0),
                              dilation=(1, 1), bn_act=True)
    out4 = jax.block_until_ready(out4)
    ref4 = _reference(x4, w4, g4, b4, stride=(1, 1), padding=(0, 0),
                      dilation=(1, 1), bn_act=True)
    _check(out4, ref4, "multi-N")

    # --- multi-K-tile case (cin=256, 3x3 -> K=2304 > 2048 -> 5 K steps) ------
    CIN5 = 256
    x5 = jax.random.normal(kx, (1, CIN5, 8, 8), dtype=jnp.float32)
    w5 = jax.random.normal(kw3, (COUT, CIN5, 3, 3), dtype=jnp.float32) * 0.05
    out5 = conv_block_forward(x5, w5, bn_gamma, bn_beta, stride=(1, 1),
                              padding=(1, 1), dilation=(1, 1), bn_act=True)
    out5 = jax.block_until_ready(out5)
    ref5 = _reference(x5, w5, bn_gamma, bn_beta, stride=(1, 1), padding=(1, 1),
                      dilation=(1, 1), bn_act=True)
    _check(out5, ref5, "multi-K", atol=3e-2, rtol=3e-2)

    print("KERNEL_OK")
</pallas_src>

<mosaic_0001>
module attributes {stable_mosaic.version = 11 : i64} {
  func.func @_conv_matmul_kernel(%arg0: i32, %arg1: i32, %arg2: i32, %arg3: memref<512x36xbf16, #tpu.memory_space<vmem>>, %arg4: memref<36x128xbf16, #tpu.memory_space<vmem>>, %arg5: memref<512x128xf32, #tpu.memory_space<vmem>>, %arg6: memref<1x8x128xf32, #tpu.memory_space<vmem>>) attributes {dimension_semantics = [#tpu.dimension_semantics<parallel>, #tpu.dimension_semantics<parallel>, #tpu.dimension_semantics<arbitrary>], iteration_bounds = array<i64: 1, 1, 1>, scalar_prefetch = 0 : i64, scratch_operands = 0 : i64, tpu.core_type = #tpu.core_type<tc>, window_params = [{transform_indices = @transform_0, window_bounds = array<i64: 512, 36>}, {transform_indices = @transform_1, window_bounds = array<i64: 36, 128>}, {transform_indices = @transform_2, window_bounds = array<i64: 512, 128>}, {transform_indices = @transform_3, window_bounds = array<i64: 1, 8, 128>}]} {
    %c0 = arith.constant 0 : index
    %c0_0 = arith.constant 0 : index
    %0 = vector.load %arg3[%c0, %c0_0] : memref<512x36xbf16, #tpu.memory_space<vmem>>, vector<512x36xbf16>
    %c0_1 = arith.constant 0 : index
    %c0_2 = arith.constant 0 : index
    %1 = vector.load %arg4[%c0_1, %c0_2] : memref<36x128xbf16, #tpu.memory_space<vmem>>, vector<36x128xbf16>
    %cst = arith.constant dense<0.000000e+00> : vector<512x128xf32>
    %2 = tpu.matmul %0, %1, %cst {dimension_numbers = #tpu.dot_dimension_numbers<[1], [0], [0], [1], [0, 0, 1, 1], [], []>} : vector<512x36xbf16>, vector<36x128xbf16>, vector<512x128xf32> -> vector<512x128xf32>
    %c0_3 = arith.constant 0 : index
    %c0_4 = arith.constant 0 : index
    %3 = vector.load %arg5[%c0_3, %c0_4] : memref<512x128xf32, #tpu.memory_space<vmem>>, vector<512x128xf32>
    tpu.vector_store %arg5[%c0_3, %c0_4], %2 {strides = array<i32>} : memref<512x128xf32, #tpu.memory_space<vmem>>, vector<512x128xf32>,
    %cst_5 = arith.constant dense<0.000000e+00> : vector<128xf32>
    %4 = vector.multi_reduction <add>, %2, %cst_5 [0] : vector<512x128xf32> to vector<128xf32>
    %5 = vector.shape_cast %4 : vector<128xf32> to vector<1x128xf32>
    %6 = arith.mulf %2, %2 : vector<512x128xf32>
    %cst_6 = arith.constant dense<0.000000e+00> : vector<128xf32>
    %7 = vector.multi_reduction <add>, %6, %cst_6 [0] : vector<512x128xf32> to vector<128xf32>
    %8 = vector.shape_cast %7 : vector<128xf32> to vector<1x128xf32>
    %cst_7 = arith.constant 0.000000e+00 : f32
    %9 = vector.broadcast %cst_7 : f32 to vector<6x128xf32>
    %10 = tpu.concatenate %5, %8, %9 in 0 : vector<1x128xf32>, vector<1x128xf32>, vector<6x128xf32> -> vector<8x128xf32>
    %11 = vector.shape_cast %10 : vector<8x128xf32> to vector<1x8x128xf32>
    %c0_8 = arith.constant 0 : index
    %c0_9 = arith.constant 0 : index
    %c0_10 = arith.constant 0 : index
    %12 = vector.load %arg6[%c0_8, %c0_9, %c0_10] : memref<1x8x128xf32, #tpu.memory_space<vmem>>, vector<1x8x128xf32>
    tpu.vector_store %arg6[%c0_8, %c0_9, %c0_10], %11 {strides = array<i32>} : memref<1x8x128xf32, #tpu.memory_space<vmem>>, vector<1x8x128xf32>,
    return
  }
  func.func @transform_0(%arg0: i32, %arg1: i32, %arg2: i32) -> (i32, i32) {
    %c0_i32 = arith.constant 0 : i32
    return %arg0, %arg2 : i32, i32
  }
  func.func @transform_1(%arg0: i32, %arg1: i32, %arg2: i32) -> (i32, i32) {
    %c0_i32 = arith.constant 0 : i32
    return %arg2, %arg1 : i32, i32
  }
  func.func @transform_2(%arg0: i32, %arg1: i32, %arg2: i32) -> (i32, i32) {
    %c0_i32 = arith.constant 0 : i32
    return %arg0, %arg1 : i32, i32
  }
  func.func @transform_3(%arg0: i32, %arg1: i32, %arg2: i32) -> (i32, i32, i32) {
    %c0_i32 = arith.constant 0 : i32
    %c0_i32_0 = arith.constant 0 : i32
    return %arg0, %c0_i32, %arg1 : i32, i32, i32
  }
}

</mosaic_0001>

<bundles_post_ra>
// kernel: tpu_custom_call.1
= control target key start
LH: loop header
LB: loop body
LE: loop exit
PB: predicated region body
PF: predicated region fallthrough
CT: control target
= control target key end

     0   :  { %9 = vsyncpa [#allocation3], 0  ;;  %vm260_vm0 = vcmask 293888   ;;  %vm357_vm1 = vcmask 1041408   ;;  %s1598_s0 = inlined_call_operand.vmem [shape: bf16[512,36], index: 0, kind: input, shape index: {}]   ;;  %s1599_s1 = inlined_call_operand.vmem [shape: bf16[36,128], index: 1, kind: input, shape index: {}]   ;;  %s1600_s2 = inlined_call_operand.hbm [shape: f32[512,128], index: 2, kind: output, shape index: {0}]   ;;  %s1601_s3 = inlined_call_operand.hbm [shape: f32[1,8,128], index: 3, kind: output, shape index: {1}]  }
   0x1   :  { %v1134_v0 = vld [vmem:[%s1599_s1] sm:$0xff]   ;;  %v1135_v1 = vld [vmem:[%s1599_s1 + $0x8] sm:$0xff]   ;;  %v1136_v2 = vld [vmem:[%s1599_s1 + $0x10] ss:$0 sps:$4 sm:$0x33]  }
   0x2   :  { %1052 = vmatprep.subr.bf16.mxu0 %v1134_v0  ;;  %v1137_v3 = vld [vmem:[%s1598_s0] sm:$0xff]   ;;  %1122 = vmatprep.subr.bf16.mxu1 %v1134_v0  ;;  %v359_v4 = vsel %vm357_vm1, %v1136_v2, 0  ;;  %v1138_v5 = vld [vmem:[%s1598_s0 + $0x8] sm:$0xff]   ;;  %v1139_v6 = vld [vmem:[%s1598_s0 + $0x10] sm:$0xff]  }
   0x3   :  { %1053 = vmatpush3.bf16.msra.mxu0 %v1134_v0  ;;  %1125 = vmatpush3.bf16.msra.mxu1 %v1134_v0  ;;  %v1140_v7 = vld [vmem:[%s1598_s0 + $0x18] sm:$0xff]   ;;  %v1141_v8 = vld [vmem:[%s1598_s0 + $0x20] sm:$0xff]   ;;  %v1154_v10 = vld [vmem:[%s1598_s0 + $0x88] sm:$0xff]  }
   0x4   :  { %1054 = vmatprep.subr.bf16.mxu0 %v1135_v1  ;;  %1058 = vmatprep.mubr.msk.bf16.mxu0 %vm260_vm0, %v1137_v3  ;;  %v1153_v9 = vld [vmem:[%s1598_s0 + $0x80] sm:$0xff]   ;;  %v1155_v11 = vld [vmem:[%s1598_s0 + $0x90] sm:$0xff]   ;;  %v1142_v12 = vld [vmem:[%s1598_s0 + $0x28] sm:$0xff]  }
   0x5   :  { %1123 = vmatprep.subr.bf16.mxu1 %v1135_v1  ;;  %1090 = vmatprep.mubr.msk.bf16.mxu1 %vm260_vm0, %v1153_v9  ;;  %v1143_v13 = vld [vmem:[%s1598_s0 + $0x30] sm:$0xff]   ;;  %v1156_v14 = vld [vmem:[%s1598_s0 + $0x98] sm:$0xff]   ;;  %v1157_v15 = vld [vmem:[%s1598_s0 + $0xa0] sm:$0xff]  }
   0x6   :  { %v1144_v16 = vld [vmem:[%s1598_s0 + $0x38] sm:$0xff]   ;;  %v1158_v17 = vld [vmem:[%s1598_s0 + $0xa8] sm:$0xff]  }
   0x7   :  { %1055 = vmatpush3.bf16.msra.mxu0 %v1135_v1  ;;  %1126 = vmatpush3.bf16.msra.mxu1 %v1135_v1 }
   0x8   :  { %1128 = vmatprep.subr.msk.bf16.mxu0 %vm357_vm1, %v1136_v2  ;;  %1129 = vmatprep.subr.msk.bf16.mxu1 %vm357_vm1, %v1136_v2 }
   0xb   :  { %1057 = vmatpush3.bf16.msra.mxu0 %v359_v4  ;;  %1127 = vmatpush3.bf16.msra.mxu1 %v359_v4 }
   0xe   :  { %1059 = vmatmul.mubr.msk.bf16.vlgmr.msra.gmra.mrb[0].mxu0 %vm260_vm0, %v1138_v5  ;;  %1091 = vmatmul.mubr.msk.bf16.vlgmr.msra.gmra.mrb[0].mxu1 %vm260_vm0, %v1154_v10 }
   0xf   :  { %1062 = vmatprep.mubr.msk.bf16.mxu0 %vm260_vm0, %v1139_v6  ;;  %1094 = vmatprep.mubr.msk.bf16.mxu1 %vm260_vm0, %v1155_v11 }
  0x16   :  { %1063 = vmatmul.mubr.msk.bf16.gmra.mrb[4].mxu0 %vm260_vm0, %v1140_v7  ;;  %1095 = vmatmul.mubr.msk.bf16.gmra.mrb[4].mxu1 %vm260_vm0, %v1156_v14 }
  0x17   :  { %1066 = vmatprep.mubr.msk.bf16.mxu0 %vm260_vm0, %v1141_v8  ;;  %1098 = vmatprep.mubr.msk.bf16.mxu1 %vm260_vm0, %v1157_v15 }
  0x1e   :  { %1067 = vmatmul.mubr.msk.bf16.gmra.mrb[8].mxu0 %vm260_vm0, %v1142_v12 }
  0x1f   :  { %1070 = vmatprep.mubr.msk.bf16.mxu0 %vm260_vm0, %v1143_v13 }
  0x20   :  { %10 = vsyncpa [#allocation5], 0  ;;  %v1145_v18 = vld [vmem:[%s1598_s0 + $0x40] sm:$0xff]   ;;  %v1159_v19 = vld [vmem:[%s1598_s0 + $0xb0] sm:$0xff]   ;;  %1099 = vmatmul.mubr.msk.bf16.gmra.mrb[8].mxu1 %vm260_vm0, %v1158_v17 }
  0x21   :  { %1102 = vmatprep.mubr.msk.bf16.mxu1 %vm260_vm0, %v1159_v19  ;;  %v1146_v20 = vld [vmem:[%s1598_s0 + $0x48] sm:$0xff]   ;;  %v1160_v21 = vld [vmem:[%s1598_s0 + $0xb8] sm:$0xff]   ;;  %v1147_v22 = vld [vmem:[%s1598_s0 + $0x50] sm:$0xff]  }
  0x22   :  { %v1161_v23 = vld [vmem:[%s1598_s0 + $0xc0] sm:$0xff]   ;;  %v1148_v24 = vld [vmem:[%s1598_s0 + $0x58] sm:$0xff]   ;;  %v1162_v25 = vld [vmem:[%s1598_s0 + $0xc8] sm:$0xff]  }
  0x23   :  { %v1149_v26 = vld [vmem:[%s1598_s0 + $0x60] sm:$0xff]   ;;  %v1163_v27 = vld [vmem:[%s1598_s0 + $0xd0] sm:$0xff]   ;;  %v1150_v28 = vld [vmem:[%s1598_s0 + $0x68] sm:$0xff]  }
  0x24   :  { %v1164_v29 = vld [vmem:[%s1598_s0 + $0xd8] sm:$0xff]   ;;  %v1151_v30 = vld [vmem:[%s1598_s0 + $0x70] sm:$0xff]   ;;  %v1165_v31 = vld [vmem:[%s1598_s0 + $0xe0] sm:$0xff]  }
  0x25   :  { %v1152_v32 = vld [vmem:[%s1598_s0 + $0x78] sm:$0xff]   ;;  %v1166_v33 = vld [vmem:[%s1598_s0 + $0xe8] sm:$0xff]   ;;  %v1167_v34 = vld [vmem:[%s1598_s0 + $0xf0] sm:$0xff]  }
  0x26   :  { %1071 = vmatmul.mubr.msk.bf16.gmra.mrb[12].mxu0 %vm260_vm0, %v1144_v16  ;;  %v1168_v35 = vld [vmem:[%s1598_s0 + $0xf8] sm:$0xff]   ;;  %s1217_s0 = smov [#allocation2]  }
  0x27   :  { %1074 = vmatprep.mubr.msk.bf16.mxu0 %vm260_vm0, %v1145_v18  ;;  %s925_s25 = sshll.u32 %s1217_s0, 4  ;;  %s926_s25 = int_to_ptr.vmem [resolvable:$true] %s925_s25 }
  0x28   :  { %1103 = vmatmul.mubr.msk.bf16.gmra.mrb[12].mxu1 %vm260_vm0, %v1160_v21  ;;  %s1169_s26 = scalar_lea.vmem %s926_s25, 8192  ;;  %p1174_p1 = scmp.lt.s32.totalorder %s926_s25, %s926_s25 }
  0x29   :  { %1106 = vmatprep.mubr.msk.bf16.mxu1 %vm260_vm0, %v1161_v23  ;;  %p1170_p0 = scmp.ne.s32.totalorder %s926_s25, %s1169_s26  ;;  %p1175_p2 = scmp.lt.s32.totalorder %s1169_s26, %s1169_s26 }
  0x2b   :  { %p1176_p3 = por %p1175_p2, %p1174_p1 }
  0x2d   :  { %p1177_p4 = pnand %p1176_p3, %p1170_p0 }
  0x2e   :  { %1075 = vmatmul.mubr.msk.bf16.gmra.mrb[16].mxu0 %vm260_vm0, %v1146_v20 }
  0x2f   :  { %1078 = vmatprep.mubr.msk.bf16.mxu0 %vm260_vm0, %v1147_v22 }
  0x30   :  { %1107 = vmatmul.mubr.msk.bf16.gmra.mrb[16].mxu1 %vm260_vm0, %v1162_v25 }
  0x31   :  { %1110 = vmatprep.mubr.msk.bf16.mxu1 %vm260_vm0, %v1163_v27 }
  0x36   :  { %1079 = vmatmul.mubr.msk.bf16.gmra.mrb[20].mxu0 %vm260_vm0, %v1148_v24 }
  0x37   :  { %1082 = vmatprep.mubr.msk.bf16.mxu0 %vm260_vm0, %v1149_v26 }
  0x38   :  { %1111 = vmatmul.mubr.msk.bf16.gmra.mrb[20].mxu1 %vm260_vm0, %v1164_v29 }
  0x39   :  { %1114 = vmatprep.mubr.msk.bf16.mxu1 %vm260_vm0, %v1165_v31 }
  0x3e   :  { %1083 = vmatmul.mubr.msk.bf16.gmra.mrb[24].mxu0 %vm260_vm0, %v1150_v28 }
  0x3f   :  { %1086 = vmatprep.mubr.msk.bf16.mxu0 %vm260_vm0, %v1151_v30 }
  0x40   :  { %1115 = vmatmul.mubr.msk.bf16.gmra.mrb[24].mxu1 %vm260_vm0, %v1166_v33 }
  0x41   :  { %1118 = vmatprep.mubr.msk.bf16.mxu1 %vm260_vm0, %v1167_v34 }
  0x46   :  { %1087 = vmatmul.mubr.msk.bf16.gmra.mrb[28].mxu0 %vm260_vm0, %v1152_v32 }
  0x48   :  { %1119 = vmatmul.mubr.msk.bf16.gmra.mrb[28].mxu1 %vm260_vm0, %v1168_v35 }
  0xe1   :  { %v1060_v36 = vpop.f32.mrb[0].mxu0  ;;  %v1381_v50 = vpop.f32.mrb[0].mxu1 }
  0xe2   :  { %652 = vst [vmem:[#allocation2 + $0x10] sm:$0xff] %v1060_v36  ;;  %v395_v37 = vpop.f32.mrb[1].mxu0  ;;  %v785_v43 = vmul.f32 %v1060_v36, %v1060_v36  ;;  %684 = vst [vmem:[#allocation2 + $0x110] sm:$0xff] %v1381_v50  ;;  %v1384_v52 = vpop.f32.mrb[1].mxu1 }
  0xe3   :  { %650 = vst [vmem:[#allocation2] sm:$0xff] %v395_v37  ;;  %v1061_v38 = vpop.f32.mrb[2].mxu0  ;;  %v783_v40 = vmul.f32 %v395_v37, %v395_v37  ;;  %682 = vst [vmem:[#allocation2 + $0x100] sm:$0xff] %v1384_v52  ;;  %v1387_v57 = vpop.f32.mrb[2].mxu1 }
  0xe4   :  { %653 = vst [vmem:[#allocation2 + $0x18] sm:$0xff] %v1061_v38  ;;  %v398_v39 = vpop.f32.mrb[3].mxu0  ;;  %v786_v46 = vmul.f32 %v1061_v38, %v1061_v38  ;;  %685 = vst [vmem:[#allocation2 + $0x118] sm:$0xff] %v1387_v57  ;;  %v1390_v59 = vpop.f32.mrb[3].mxu1 }
  0xe5   :  { %651 = vst [vmem:[#allocation2 + $0x8] sm:$0xff] %v398_v39  ;;  %v714_v41 = vadd.f32 %v398_v39, %v395_v37  ;;  %v784_v42 = vmul.f32 %v398_v39, %v398_v39  ;;  %683 = vst [vmem:[#allocation2 + $0x108] sm:$0xff] %v1390_v59 }
  0xe7   :  { %v715_v44 = vadd.f32 %v1060_v36, %v714_v41  ;;  %v847_v45 = vadd.f32 %v784_v42, %v783_v40 }
  0xe9   :  { %v848_v47 = vadd.f32 %v847_v45, %v785_v43  ;;  %v1064_v48 = vpop.f32.mrb[4].mxu0  ;;  %v716_v49 = vadd.f32 %v1061_v38, %v715_v44  ;;  %v1393_v6 = vpop.f32.mrb[4].mxu1 }
  0xea   :  { %656 = vst [vmem:[#allocation2 + $0x30] sm:$0xff] %v1064_v48  ;;  %v411_v51 = vpop.f32.mrb[5].mxu0  ;;  %v789_v63 = vmul.f32 %v1064_v48, %v1064_v48  ;;  %688 = vst [vmem:[#allocation2 + $0x130] sm:$0xff] %v1393_v6  ;;  %v1396_v8 = vpop.f32.mrb[5].mxu1 }
  0xeb   :  { %654 = vst [vmem:[#allocation2 + $0x20] sm:$0xff] %v411_v51  ;;  %v717_v53 = vadd.f32 %v716_v49, %v411_v51  ;;  %v787_v54 = vmul.f32 %v411_v51, %v411_v51  ;;  %v849_v55 = vadd.f32 %v848_v47, %v786_v46  ;;  %v1065_v56 = vpop.f32.mrb[6].mxu0  ;;  %686 = vst [vmem:[#allocation2 + $0x120] sm:$0xff] %v1396_v8  ;;  %v1399_v13 = vpop.f32.mrb[6].mxu1 }
  0xec   :  { %657 = vst [vmem:[#allocation2 + $0x38] sm:$0xff] %v1065_v56  ;;  %v414_v58 = vpop.f32.mrb[7].mxu0  ;;  %v790_v2 = vmul.f32 %v1065_v56, %v1065_v56  ;;  %689 = vst [vmem:[#allocation2 + $0x138] sm:$0xff] %v1399_v13  ;;  %v1402_v15 = vpop.f32.mrb[7].mxu1 }
  0xed   :  { %v850_v60 = vadd.f32 %v849_v55, %v787_v54  ;;  %655 = vst [vmem:[#allocation2 + $0x28] sm:$0xff] %v414_v58  ;;  %v718_v61 = vadd.f32 %v717_v53, %v414_v58  ;;  %v788_v62 = vmul.f32 %v414_v58, %v414_v58  ;;  %687 = vst [vmem:[#allocation2 + $0x128] sm:$0xff] %v1402_v15 }
  0xef   :  { %v719_v0 = vadd.f32 %v1064_v48, %v718_v61  ;;  %v851_v1 = vadd.f32 %v850_v60, %v788_v62 }
  0xf1   :  { %v852_v3 = vadd.f32 %v851_v1, %v789_v63  ;;  %v1068_v4 = vpop.f32.mrb[8].mxu0  ;;  %v720_v5 = vadd.f32 %v1065_v56, %v719_v0 }
  0xf2   :  { %660 = vst [vmem:[#allocation2 + $0x50] sm:$0xff] %v1068_v4  ;;  %v427_v7 = vpop.f32.mrb[9].mxu0  ;;  %v793_v19 = vmul.f32 %v1068_v4, %v1068_v4 }
  0xf3   :  { %658 = vst [vmem:[#allocation2 + $0x40] sm:$0xff] %v427_v7  ;;  %v721_v9 = vadd.f32 %v720_v5, %v427_v7  ;;  %v791_v10 = vmul.f32 %v427_v7, %v427_v7  ;;  %v853_v11 = vadd.f32 %v852_v3, %v790_v2  ;;  %v1069_v12 = vpop.f32.mrb[10].mxu0  ;;  %v1405_v26 = vpop.f32.mrb[8].mxu1 }
  0xf4   :  { %661 = vst [vmem:[#allocation2 + $0x58] sm:$0xff] %v1069_v12  ;;  %v430_v14 = vpop.f32.mrb[11].mxu0  ;;  %v794_v22 = vmul.f32 %v1069_v12, %v1069_v12  ;;  %692 = vst [vmem:[#allocation2 + $0x150] sm:$0xff] %v1405_v26  ;;  %v1408_v28 = vpop.f32.mrb[9].mxu1 }
  0xf5   :  { %v854_v16 = vadd.f32 %v853_v11, %v791_v10  ;;  %659 = vst [vmem:[#allocation2 + $0x48] sm:$0xff] %v430_v14  ;;  %v722_v17 = vadd.f32 %v721_v9, %v430_v14  ;;  %v792_v18 = vmul.f32 %v430_v14, %v430_v14  ;;  %690 = vst [vmem:[#allocation2 + $0x140] sm:$0xff] %v1408_v28  ;;  %v1411_v33 = vpop.f32.mrb[10].mxu1 }
  0xf6   :  { %693 = vst [vmem:[#allocation2 + $0x158] sm:$0xff] %v1411_v33  ;;  %v1414_v35 = vpop.f32.mrb[11].mxu1 }
  0xf7   :  { %v723_v20 = vadd.f32 %v1068_v4, %v722_v17  ;;  %v855_v21 = vadd.f32 %v854_v16, %v792_v18  ;;  %691 = vst [vmem:[#allocation2 + $0x148] sm:$0xff] %v1414_v35 }
  0xf9   :  { %v856_v23 = vadd.f32 %v855_v21, %v793_v19  ;;  %v1072_v24 = vpop.f32.mrb[12].mxu0  ;;  %v724_v25 = vadd.f32 %v1069_v12, %v723_v20 }
  0xfa   :  { %664 = vst [vmem:[#allocation2 + $0x70] sm:$0xff] %v1072_v24  ;;  %v443_v27 = vpop.f32.mrb[13].mxu0  ;;  %v797_v39 = vmul.f32 %v1072_v24, %v1072_v24 }
  0xfb   :  { %662 = vst [vmem:[#allocation2 + $0x60] sm:$0xff] %v443_v27  ;;  %v725_v29 = vadd.f32 %v724_v25, %v443_v27  ;;  %v795_v30 = vmul.f32 %v443_v27, %v443_v27  ;;  %v857_v31 = vadd.f32 %v856_v23, %v794_v22  ;;  %v1073_v32 = vpop.f32.mrb[14].mxu0  ;;  %v1417_v46 = vpop.f32.mrb[12].mxu1 }
  0xfc   :  { %665 = vst [vmem:[#allocation2 + $0x78] sm:$0xff] %v1073_v32  ;;  %v446_v34 = vpop.f32.mrb[15].mxu0  ;;  %v798_v42 = vmul.f32 %v1073_v32, %v1073_v32  ;;  %696 = vst [vmem:[#allocation2 + $0x170] sm:$0xff] %v1417_v46  ;;  %v1420_v48 = vpop.f32.mrb[13].mxu1 }
  0xfd   :  { %v858_v36 = vadd.f32 %v857_v31, %v795_v30  ;;  %663 = vst [vmem:[#allocation2 + $0x68] sm:$0xff] %v446_v34  ;;  %v726_v37 = vadd.f32 %v725_v29, %v446_v34  ;;  %v796_v38 = vmul.f32 %v446_v34, %v446_v34  ;;  %694 = vst [vmem:[#allocation2 + $0x160] sm:$0xff] %v1420_v48  ;;  %v1423_v55 = vpop.f32.mrb[14].mxu1 }
  0xfe   :  { %697 = vst [vmem:[#allocation2 + $0x178] sm:$0xff] %v1423_v55  ;;  %v1426_v58 = vpop.f32.mrb[15].mxu1 }
  0xff   :  { %v727_v40 = vadd.f32 %v1072_v24, %v726_v37  ;;  %v859_v41 = vadd.f32 %v858_v36, %v796_v38  ;;  %695 = vst [vmem:[#allocation2 + $0x168] sm:$0xff] %v1426_v58 }
 0x101   :  { %v860_v43 = vadd.f32 %v859_v41, %v797_v39  ;;  %v1076_v44 = vpop.f32.mrb[16].mxu0  ;;  %v728_v45 = vadd.f32 %v1073_v32, %v727_v40 }
 0x102   :  { %668 = vst [vmem:[#allocation2 + $0x90] sm:$0xff] %v1076_v44  ;;  %v459_v47 = vpop.f32.mrb[17].mxu0  ;;  %v801_v63 = vmul.f32 %v1076_v44, %v1076_v44 }
 0x103   :  { %666 = vst [vmem:[#allocation2 + $0x80] sm:$0xff] %v459_v47  ;;  %v729_v49 = vadd.f32 %v728_v45, %v459_v47  ;;  %v799_v51 = vmul.f32 %v459_v47, %v459_v47  ;;  %v861_v53 = vadd.f32 %v860_v43, %v798_v42  ;;  %v1077_v54 = vpop.f32.mrb[18].mxu0  ;;  %v1429_v7 = vpop.f32.mrb[16].mxu1 }
 0x104   :  { %669 = vst [vmem:[#allocation2 + $0x98] sm:$0xff] %v1077_v54  ;;  %v462_v56 = vpop.f32.mrb[19].mxu0  ;;  %v802_v2 = vmul.f32 %v1077_v54, %v1077_v54  ;;  %700 = vst [vmem:[#allocation2 + $0x190] sm:$0xff] %v1429_v7  ;;  %v1432_v10 = vpop.f32.mrb[17].mxu1 }
 0x105   :  { %v862_v60 = vadd.f32 %v861_v53, %v799_v51  ;;  %667 = vst [vmem:[#allocation2 + $0x88] sm:$0xff] %v462_v56  ;;  %v730_v61 = vadd.f32 %v729_v49, %v462_v56  ;;  %v800_v62 = vmul.f32 %v462_v56, %v462_v56  ;;  %698 = vst [vmem:[#allocation2 + $0x180] sm:$0xff] %v1432_v10  ;;  %v1435_v17 = vpop.f32.mrb[18].mxu1 }
 0x106   :  { %701 = vst [vmem:[#allocation2 + $0x198] sm:$0xff] %v1435_v17  ;;  %v1438_v19 = vpop.f32.mrb[19].mxu1 }
 0x107   :  { %v731_v0 = vadd.f32 %v1076_v44, %v730_v61  ;;  %v863_v1 = vadd.f32 %v862_v60, %v800_v62  ;;  %699 = vst [vmem:[#allocation2 + $0x188] sm:$0xff] %v1438_v19 }
 0x109   :  { %v864_v3 = vadd.f32 %v863_v1, %v801_v63  ;;  %v1080_v4 = vpop.f32.mrb[20].mxu0  ;;  %v732_v5 = vadd.f32 %v1077_v54, %v731_v0 }
 0x10a   :  { %672 = vst [vmem:[#allocation2 + $0xb0] sm:$0xff] %v1080_v4  ;;  %v475_v9 = vpop.f32.mrb[21].mxu0  ;;  %v805_v23 = vmul.f32 %v1080_v4, %v1080_v4 }
 0x10b   :  { %670 = vst [vmem:[#allocation2 + $0xa0] sm:$0xff] %v475_v9  ;;  %v733_v11 = vadd.f32 %v732_v5, %v475_v9  ;;  %v803_v12 = vmul.f32 %v475_v9, %v475_v9  ;;  %v865_v14 = vadd.f32 %v864_v3, %v802_v2  ;;  %v1081_v16 = vpop.f32.mrb[22].mxu0  ;;  %v1441_v32 = vpop.f32.mrb[20].mxu1 }
 0x10c   :  { %673 = vst [vmem:[#allocation2 + $0xb8] sm:$0xff] %v1081_v16  ;;  %v478_v18 = vpop.f32.mrb[23].mxu0  ;;  %v806_v27 = vmul.f32 %v1081_v16, %v1081_v16  ;;  %704 = vst [vmem:[#allocation2 + $0x1b0] sm:$0xff] %v1441_v32  ;;  %v1444_v36 = vpop.f32.mrb[21].mxu1 }
 0x10d   :  { %v866_v20 = vadd.f32 %v865_v14, %v803_v12  ;;  %671 = vst [vmem:[#allocation2 + $0xa8] sm:$0xff] %v478_v18  ;;  %v734_v21 = vadd.f32 %v733_v11, %v478_v18  ;;  %v804_v22 = vmul.f32 %v478_v18, %v478_v18  ;;  %702 = vst [vmem:[#allocation2 + $0x1a0] sm:$0xff] %v1444_v36  ;;  %v1447_v41 = vpop.f32.mrb[22].mxu1 }
 0x10e   :  { %705 = vst [vmem:[#allocation2 + $0x1b8] sm:$0xff] %v1447_v41  ;;  %v1450_v43 = vpop.f32.mrb[23].mxu1 }
 0x10f   :  { %v735_v24 = vadd.f32 %v1080_v4, %v734_v21  ;;  %v867_v25 = vadd.f32 %v866_v20, %v804_v22  ;;  %703 = vst [vmem:[#allocation2 + $0x1a8] sm:$0xff] %v1450_v43 }
 0x111   :  { %v868_v29 = vadd.f32 %v867_v25, %v805_v23  ;;  %v1084_v30 = vpop.f32.mrb[24].mxu0  ;;  %v736_v31 = vadd.f32 %v1081_v16, %v735_v24  ;;  %v815_v25 = vmul.f32 %v1384_v52, %v1384_v52 }
 0x112   :  { %676 = vst [vmem:[#allocation2 + $0xd0] sm:$0xff] %v1084_v30  ;;  %v491_v34 = vpop.f32.mrb[25].mxu0  ;;  %v809_v49 = vmul.f32 %v1084_v30, %v1084_v30 }
 0x113   :  { %674 = vst [vmem:[#allocation2 + $0xc0] sm:$0xff] %v491_v34  ;;  %v737_v37 = vadd.f32 %v736_v31, %v491_v34  ;;  %v807_v38 = vmul.f32 %v491_v34, %v491_v34  ;;  %v869_v39 = vadd.f32 %v868_v29, %v806_v27  ;;  %v1085_v40 = vpop.f32.mrb[26].mxu0  ;;  %v1453_v62 = vpop.f32.mrb[24].mxu1 }
 0x114   :  { %677 = vst [vmem:[#allocation2 + $0xd8] sm:$0xff] %v1085_v40  ;;  %v494_v42 = vpop.f32.mrb[27].mxu0  ;;  %v810_v54 = vmul.f32 %v1085_v40, %v1085_v40  ;;  %708 = vst [vmem:[#allocation2 + $0x1d0] sm:$0xff] %v1453_v62  ;;  %v1456_v0 = vpop.f32.mrb[25].mxu1 }
 0x115   :  { %v870_v44 = vadd.f32 %v869_v39, %v807_v38  ;;  %675 = vst [vmem:[#allocation2 + $0xc8] sm:$0xff] %v494_v42  ;;  %v738_v45 = vadd.f32 %v737_v37, %v494_v42  ;;  %v808_v47 = vmul.f32 %v494_v42, %v494_v42  ;;  %706 = vst [vmem:[#allocation2 + $0x1c0] sm:$0xff] %v1456_v0  ;;  %v1459_v5 = vpop.f32.mrb[26].mxu1 }
 0x116   :  { %709 = vst [vmem:[#allocation2 + $0x1d8] sm:$0xff] %v1459_v5  ;;  %v1462_v11 = vpop.f32.mrb[27].mxu1 }
 0x117   :  { %v739_v51 = vadd.f32 %v1084_v30, %v738_v45  ;;  %v871_v53 = vadd.f32 %v870_v44, %v808_v47  ;;  %707 = vst [vmem:[#allocation2 + $0x1c8] sm:$0xff] %v1462_v11 }
 0x119   :  { %v872_v56 = vadd.f32 %v871_v53, %v809_v49  ;;  %v1088_v60 = vpop.f32.mrb[28].mxu0  ;;  %v740_v61 = vadd.f32 %v1085_v40, %v739_v51  ;;  %v816_v40 = vmul.f32 %v1390_v59, %v1390_v59 }
 0x11a   :  { %680 = vst [vmem:[#allocation2 + $0xf0] sm:$0xff] %v1088_v60  ;;  %v507_v63 = vpop.f32.mrb[29].mxu0  ;;  %v813_v18 = vmul.f32 %v1088_v60, %v1088_v60 }
 0x11b   :  { %678 = vst [vmem:[#allocation2 + $0xe0] sm:$0xff] %v507_v63  ;;  %v741_v1 = vadd.f32 %v740_v61, %v507_v63  ;;  %v811_v2 = vmul.f32 %v507_v63, %v507_v63  ;;  %v873_v3 = vadd.f32 %v872_v56, %v810_v54  ;;  %v1089_v4 = vpop.f32.mrb[30].mxu0  ;;  %v1467_v27 = vpop.f32.mrb[28].mxu1 }
 0x11c   :  { %681 = vst [vmem:[#allocation2 + $0xf8] sm:$0xff] %v1089_v4  ;;  %v510_v9 = vpop.f32.mrb[31].mxu0  ;;  %v814_v22 = vmul.f32 %v1089_v4, %v1089_v4  ;;  %712 = vst [vmem:[#allocation2 + $0x1f0] sm:$0xff] %v1467_v27  ;;  %v1470_v29 = vpop.f32.mrb[29].mxu1 }
 0x11d   :  { %v874_v12 = vadd.f32 %v873_v3, %v811_v2  ;;  %679 = vst [vmem:[#allocation2 + $0xe8] sm:$0xff] %v510_v9  ;;  %v742_v14 = vadd.f32 %v741_v1, %v510_v9  ;;  %v812_v16 = vmul.f32 %v510_v9, %v510_v9  ;;  %710 = vst [vmem:[#allocation2 + $0x1e0] sm:$0xff] %v1470_v29  ;;  %v1474_v34 = vpop.f32.mrb[30].mxu1 }
 0x11e   :  { %713 = vst [vmem:[#allocation2 + $0x1f8] sm:$0xff] %v1474_v34  ;;  %v1477_v37 = vpop.f32.mrb[31].mxu1 }
 0x11f   :  { %v743_v20 = vadd.f32 %v1088_v60, %v742_v14  ;;  %v875_v21 = vadd.f32 %v874_v12, %v812_v16  ;;  %711 = vst [vmem:[#allocation2 + $0x1e8] sm:$0xff] %v1477_v37 }
 0x121   :  { %v876_v23 = vadd.f32 %v875_v21, %v813_v18  ;;  %v744_v24 = vadd.f32 %v1089_v4, %v743_v20 }
 0x123   :  { %v745_v30 = vadd.f32 %v744_v24, %v1384_v52  ;;  %v877_v31 = vadd.f32 %v876_v23, %v814_v22 }
 0x125   :  { %v878_v38 = vadd.f32 %v877_v31, %v815_v25  ;;  %v746_v39 = vadd.f32 %v745_v30, %v1390_v59 }
 0x126   :  { %1180 = shalt.err (!%p1177_p4)
}
 0x127   :  { %s1181_s29 = scalar_lea.hbm %s1600_s2, 8192 }
 0x128   :  { %p1182_p5 = scmp.ne.s32.totalorder %s1600_s2, %s1181_s29  ;;  %p1185_p6 = scmp.lt.u32.totalorder %s1181_s29, %s1600_s2 }
 0x12a   :  { %p1187_p7 = pnand %p1185_p6, %p1182_p5 }
 0x12c   :  { %1190 = shalt.err (!%p1187_p7)
}
 0x12d   :  { %s1218_s7 = smov 128   ;;  %s1219_s8 = smov 8   ;;  %v817_v52 = vmul.f32 %v1381_v50, %v1381_v50  ;;  %v747_v59 = vadd.f32 %v1381_v50, %v746_v39  ;;  %v879_v42 = vadd.f32 %v878_v38, %v816_v40  ;;  %v818_v44 = vmul.f32 %v1387_v57, %v1387_v57 }
 0x12e   :  { %931 = dma.vmem_to_hbm [thread:$0]  %s926_s25, 8192, %s1600_s2, [#allocation3], %s1218_s7, %s1218_s7, %s1219_s8   ;;  %v819_v49 = vmul.f32 %v1396_v8, %v1396_v8  ;;  %v820_v60 = vmul.f32 %v1402_v15, %v1402_v15  ;;  %v821_v50 = vmul.f32 %v1393_v6, %v1393_v6  ;;  %v824_v12 = vmul.f32 %v1414_v35, %v1414_v35 }
 0x12f   :  { %v880_v45 = vadd.f32 %v879_v42, %v817_v52  ;;  %v748_v47 = vadd.f32 %v1387_v57, %v747_v59  ;;  %v822_v57 = vmul.f32 %v1399_v13, %v1399_v13  ;;  %v828_v24 = vmul.f32 %v1426_v58, %v1426_v58  ;;  %s1220_s2 = smov [#allocation4]  }
 0x130   :  { %v832_v59 = vmul.f32 %v1438_v19, %v1438_v19  ;;  %vm916_vm2 = vcmask 1040384   ;;  %s938_s11 = sshll.u32 %s1220_s2, 4  ;;  %s939_s11 = int_to_ptr.vmem [resolvable:$true] %s938_s11 }
 0x131   :  { %v749_v51 = vadd.f32 %v748_v47, %v1396_v8  ;;  %v881_v53 = vadd.f32 %v880_v45, %v818_v44  ;;  %v823_v8 = vmul.f32 %v1408_v28, %v1408_v28  ;;  %s1191_s12 = scalar_lea.vmem %s939_s11, 128  ;;  %p1196_p9 = scmp.lt.s32.totalorder %s939_s11, %s939_s11 }
 0x132   :  { %p1192_p8 = scmp.ne.s32.totalorder %s939_s11, %s1191_s12  ;;  %p1197_p10 = scmp.lt.s32.totalorder %s1191_s12, %s1191_s12 }
 0x133   :  { %v882_v54 = vadd.f32 %v881_v53, %v819_v49  ;;  %v750_v56 = vadd.f32 %v749_v51, %v1402_v15 }
 0x134   :  { %p1198_p11 = por %p1197_p10, %p1196_p9 }
 0x135   :  { %v751_v61 = vadd.f32 %v1393_v6, %v750_v56  ;;  %v883_v63 = vadd.f32 %v882_v54, %v820_v60  ;;  %v825_v6 = vmul.f32 %v1405_v26, %v1405_v26  ;;  %v836_v54 = vmul.f32 %v1450_v43, %v1450_v43 }
 0x136   :  { %p1199_p12 = pnand %p1198_p11, %p1192_p8 }
 0x137   :  { %v884_v1 = vadd.f32 %v883_v63, %v821_v50  ;;  %v752_v2 = vadd.f32 %v1399_v13, %v751_v61  ;;  %v826_v13 = vmul.f32 %v1411_v33, %v1411_v33 }
 0x139   :  { %v753_v3 = vadd.f32 %v752_v2, %v1408_v28  ;;  %v885_v4 = vadd.f32 %v884_v1, %v822_v57  ;;  %v827_v28 = vmul.f32 %v1420_v48, %v1420_v48  ;;  %v840_v2 = vmul.f32 %v1462_v11, %v1462_v11 }
 0x13b   :  { %v886_v9 = vadd.f32 %v885_v4, %v823_v8  ;;  %v754_v15 = vadd.f32 %v753_v3, %v1414_v35 }
 0x13d   :  { %v755_v14 = vadd.f32 %v1405_v26, %v754_v15  ;;  %v887_v16 = vadd.f32 %v886_v9, %v824_v12  ;;  %v829_v26 = vmul.f32 %v1417_v46, %v1417_v46 }
 0x13f   :  { %v888_v18 = vadd.f32 %v887_v16, %v825_v6  ;;  %v756_v20 = vadd.f32 %v1411_v33, %v755_v14  ;;  %v830_v33 = vmul.f32 %v1423_v55, %v1423_v55  ;;  %v844_v14 = vmul.f32 %v1477_v37, %v1477_v37 }
 0x141   :  { %v757_v21 = vadd.f32 %v756_v20, %v1420_v48  ;;  %v889_v22 = vadd.f32 %v888_v18, %v826_v13  ;;  %v831_v48 = vmul.f32 %v1432_v10, %v1432_v10 }
 0x143   :  { %v890_v23 = vadd.f32 %v889_v22, %v827_v28  ;;  %v758_v35 = vadd.f32 %v757_v21, %v1426_v58 }
 0x145   :  { %v759_v25 = vadd.f32 %v1417_v46, %v758_v35  ;;  %v891_v30 = vadd.f32 %v890_v23, %v828_v24  ;;  %v833_v46 = vmul.f32 %v1429_v7, %v1429_v7 }
 0x147   :  { %v892_v31 = vadd.f32 %v891_v30, %v829_v26  ;;  %v760_v38 = vadd.f32 %v1423_v55, %v759_v25  ;;  %v834_v55 = vmul.f32 %v1435_v17, %v1435_v17 }
 0x149   :  { %v761_v39 = vadd.f32 %v760_v38, %v1432_v10  ;;  %v893_v40 = vadd.f32 %v892_v31, %v830_v33  ;;  %v835_v10 = vmul.f32 %v1444_v36, %v1444_v36 }
 0x14b   :  { %v894_v52 = vadd.f32 %v893_v40, %v831_v48  ;;  %v762_v58 = vadd.f32 %v761_v39, %v1438_v19 }
 0x14d   :  { %v763_v42 = vadd.f32 %v1429_v7, %v762_v58  ;;  %v895_v44 = vadd.f32 %v894_v52, %v832_v59  ;;  %v837_v7 = vmul.f32 %v1441_v32, %v1441_v32 }
 0x14f   :  { %v896_v45 = vadd.f32 %v895_v44, %v833_v46  ;;  %v764_v47 = vadd.f32 %v1435_v17, %v763_v42  ;;  %v838_v17 = vmul.f32 %v1447_v41, %v1447_v41 }
 0x151   :  { %v765_v49 = vadd.f32 %v764_v47, %v1444_v36  ;;  %v897_v51 = vadd.f32 %v896_v45, %v834_v55  ;;  %v839_v36 = vmul.f32 %v1456_v0, %v1456_v0 }
 0x153   :  { %v898_v53 = vadd.f32 %v897_v51, %v835_v10  ;;  %v766_v19 = vadd.f32 %v765_v49, %v1450_v43 }
 0x155   :  { %v767_v56 = vadd.f32 %v1441_v32, %v766_v19  ;;  %v899_v60 = vadd.f32 %v898_v53, %v836_v54  ;;  %v841_v32 = vmul.f32 %v1453_v62, %v1453_v62 }
 0x157   :  { %v900_v50 = vadd.f32 %v899_v60, %v837_v7  ;;  %v768_v61 = vadd.f32 %v1447_v41, %v767_v56  ;;  %v842_v41 = vmul.f32 %v1459_v5, %v1459_v5 }
 0x159   :  { %v769_v63 = vadd.f32 %v768_v61, %v1456_v0  ;;  %v901_v57 = vadd.f32 %v900_v50, %v838_v17  ;;  %v843_v0 = vmul.f32 %v1470_v29, %v1470_v29 }
 0x15b   :  { %v902_v1 = vadd.f32 %v901_v57, %v839_v36  ;;  %v770_v43 = vadd.f32 %v769_v63, %v1462_v11 }
 0x15d   :  { %v771_v8 = vadd.f32 %v1453_v62, %v770_v43  ;;  %v903_v3 = vadd.f32 %v902_v1, %v840_v2  ;;  %v845_v62 = vmul.f32 %v1467_v27, %v1467_v27 }
 0x15f   :  { %v904_v4 = vadd.f32 %v903_v3, %v841_v32  ;;  %v772_v9 = vadd.f32 %v1459_v5, %v771_v8  ;;  %v846_v5 = vmul.f32 %v1474_v34, %v1474_v34 }
 0x161   :  { %v773_v15 = vadd.f32 %v772_v9, %v1470_v29  ;;  %v905_v12 = vadd.f32 %v904_v4, %v842_v41 }
 0x163   :  { %v906_v6 = vadd.f32 %v905_v12, %v843_v0  ;;  %v774_v11 = vadd.f32 %v773_v15, %v1477_v37 }
 0x165   :  { %v775_v16 = vadd.f32 %v1467_v27, %v774_v11  ;;  %v907_v13 = vadd.f32 %v906_v6, %v844_v14 }
 0x167   :  { %v776_v18 = vadd.f32 %v1474_v34, %v775_v16  ;;  %v908_v20 = vadd.f32 %v907_v13, %v845_v62 }
 0x169   :  { %v777_v29 = vrot.slane %v776_v18, 4  ;;  %v909_v28 = vadd.f32 %v908_v20, %v846_v5 }
 0x16b   :  { %v778_v21 = vadd.f32 %v777_v29, %v776_v18  ;;  %v910_v22 = vrot.slane %v909_v28, 4 }
 0x16d   :  { %v779_v23 = vrot.slane %v778_v21, 2  ;;  %v911_v35 = vadd.f32 %v910_v22, %v909_v28 }
 0x16f   :  { %v780_v24 = vadd.f32 %v779_v23, %v778_v21  ;;  %v912_v37 = vrot.slane %v911_v35, 2 }
 0x171   :  { %v781_v26 = vrot.slane %v780_v24, 1  ;;  %v913_v25 = vadd.f32 %v912_v37, %v911_v35 }
 0x173   :  { %v914_v30 = vrot.slane %v913_v25, 1  ;;  %v782_v27 = vadd.f32 %v781_v26, %v780_v24 }
 0x175   :  { %v915_v33 = vadd.f32 %v914_v30, %v913_v25 }
 0x177   :  { %v917_v31 = vsel %vm916_vm2, %v782_v27, %v915_v33 }
 0x178   :  { %v918_v34 = vsel %vm357_vm1, %v917_v31, 0.0 }
 0x179   :  { %919 = vst [vmem:[#allocation4] sm:$0xff] %v918_v34 }
 0x17a   :  { %1202 = shalt.err (!%p1199_p12)
}
 0x17b   :  { %s1203_s15 = scalar_lea.hbm %s1601_s3, 128 }
 0x17c   :  { %p1204_p13 = scmp.ne.s32.totalorder %s1601_s3, %s1203_s15  ;;  %p1207_p0 = scmp.lt.u32.totalorder %s1203_s15, %s1601_s3 }
 0x17e   :  { %p1209_p1 = pnand %p1207_p0, %p1204_p13 }
 0x180   :  { %1212 = shalt.err (!%p1209_p1)
}
 0x181   :  { %941 = dma.vmem_to_hbm [thread:$0]  %s939_s11, 128, %s1601_s3, [#allocation5]  }
 0x182   :  { %1213 = dma.done.wait [#allocation3], 8192  }
 0x183   :  { %1214 = vsyncadd [#allocation3], 4294959104 }
 0x184   :  { %1215 = dma.done.wait [#allocation5], 128  }
 0x185   :  { %1216 = vsyncadd [#allocation5], 4294967168 }
 0x186   :  { %948 = vsyncpa [#allocation3], 1 }
 0x187   :  { %949 = vsyncpa [#allocation5], 1 }

</bundles_post_ra>
